<compile_context>
chip_gen: v7x
topology: tpu7x:2x2x1
jax: 0.10.0
libtpu: 0.0.40
codegen_flags: <defaults>
</compile_context>

<pallas_src>
import functools

import jax
import jax.numpy as jnp
from jax.experimental import pallas as pl
from jax.experimental.pallas import tpu as pltpu

_LANE = 128


def _ru(x, m):
    """Round x up to a multiple of m."""
    return (x + m - 1) // m * m


def _layout(input_dim, latent_dim):
    """Static row offsets of each weight inside the packed (rows, 128) slab."""
    lo = {}
    row = 0
    lo["w1"] = row; row += _ru(input_dim, 8)    # (input_dim, 128)
    lo["w2"] = row; row += _ru(128, 8)          # (128, 64)
    lo["wh"] = row; row += _ru(64, 8)           # (64, 2*latent)  fused mu|log_var
    lo["w3"] = row; row += _ru(latent_dim, 8)   # (latent, 64)
    lo["w4"] = row; row += _ru(64, 8)           # (64, 128)
    lo["w5"] = row; row += _ru(128, 8)          # (128, input_dim)
    lo["rows"] = _ru(row, 8)
    return lo


def _vae_kernel(x_ref, eps_ref, w_ref, b_ref, out_ref, *,
                input_dim, latent_dim, lo):
    f32 = jnp.float32
    L = latent_dim
    tb = x_ref.shape[0]

    x = x_ref[...]          # (TB, input_dim)
    eps = eps_ref[...]      # (TB, L)

    # ---- encoder: Linear(input,128) -> ReLU -> Linear(128,64) -> ReLU ----
    w1 = w_ref[lo["w1"]:lo["w1"] + input_dim, 0:128]
    h1 = jnp.dot(x, w1, preferred_element_type=f32) + b_ref[0:1, 0:128]
    h1 = jnp.maximum(h1, 0.0)

    w2 = w_ref[lo["w2"]:lo["w2"] + 128, 0:64]
    h2 = jnp.dot(h1, w2, preferred_element_type=f32) + b_ref[1:2, 0:64]
    h2 = jnp.maximum(h2, 0.0)

    # ---- fused mu | log_var head: one MXU dot, lane-contiguous result ----
    wh = w_ref[lo["wh"]:lo["wh"] + 64, 0:2 * L]
    heads = jnp.dot(h2, wh, preferred_element_type=f32) + b_ref[2:3, 0:2 * L]
    mu = heads[:, 0:L]
    lv = heads[:, L:2 * L]

    # ---- reparameterize: z = mu + eps * exp(0.5 * log_var) ----
    z = mu + eps * jnp.exp(0.5 * lv)

    # ---- decoder layer 1: K = latent_dim (tiny) -> VPU broadcast-FMA ----
    d1 = jnp.broadcast_to(b_ref[3:4, 0:64], (tb, 64))
    for l in range(L):                                        # L is tiny/static
        w3_row = w_ref[lo["w3"] + l:lo["w3"] + l + 1, 0:64]   # (1, 64)
        d1 = d1 + z[:, l:l + 1] * w3_row
    d1 = jnp.maximum(d1, 0.0)

    # ---- decoder: Linear(64,128) -> ReLU -> Linear(128,input) -> Tanh ----
    w4 = w_ref[lo["w4"]:lo["w4"] + 64, 0:128]
    d2 = jnp.dot(d1, w4, preferred_element_type=f32) + b_ref[4:5, 0:128]
    d2 = jnp.maximum(d2, 0.0)

    w5 = w_ref[lo["w5"]:lo["w5"] + 128, 0:input_dim]
    d3 = jnp.dot(d2, w5, preferred_element_type=f32) + b_ref[5:6, 0:input_dim]
    decoded = jnp.tanh(d3)

    # ---- single lane-dense output slab: [decoded | mu | log_var | pad] ----
    used = input_dim + 2 * L
    pad = out_ref.shape[1] - used
    parts = [decoded, mu, lv]
    if pad > 0:
        parts.append(jnp.zeros((tb, pad), f32))
    out_ref[...] = jnp.concatenate(parts, axis=-1).astype(out_ref.dtype)


@jax.jit
def vae_forward(x, eps, params):
    """VAE forward. x: (B, input_dim), eps: (B, latent_dim) ~ N(0,1)."""
    B, input_dim = x.shape
    latent_dim = eps.shape[1]
    L = latent_dim
    assert input_dim <= _LANE and 2 * L <= _LANE, (
        "packed-slab kernel assumes feature dims fit in 128 lanes")
    lo = _layout(input_dim, latent_dim)

    # ---- pack the 14 parameter tensors into two slabs (2 resident DMAs) ----
    wslab = jnp.zeros((lo["rows"], _LANE), jnp.float32)
    wslab = wslab.at[lo["w1"]:lo["w1"] + input_dim, 0:128].set(params["w1"])
    wslab = wslab.at[lo["w2"]:lo["w2"] + 128, 0:64].set(params["w2"])
    wh = jnp.concatenate([params["wmu"], params["wlv"]], axis=1)
    wslab = wslab.at[lo["wh"]:lo["wh"] + 64, 0:2 * L].set(wh)
    wslab = wslab.at[lo["w3"]:lo["w3"] + L, 0:64].set(params["w3"])
    wslab = wslab.at[lo["w4"]:lo["w4"] + 64, 0:128].set(params["w4"])
    wslab = wslab.at[lo["w5"]:lo["w5"] + 128, 0:input_dim].set(params["w5"])

    bslab = jnp.zeros((8, _LANE), jnp.float32)
    bslab = bslab.at[0, 0:128].set(params["b1"])
    bslab = bslab.at[1, 0:64].set(params["b2"])
    bh = jnp.concatenate([params["bmu"], params["blv"]])
    bslab = bslab.at[2, 0:2 * L].set(bh)
    bslab = bslab.at[3, 0:64].set(params["b3"])
    bslab = bslab.at[4, 0:128].set(params["b4"])
    bslab = bslab.at[5, 0:input_dim].set(params["b5"])

    # ---- batch tiling: large M tiles, weights resident across steps ----
    TB = min(512, _ru(B, 8))
    Bpad = _ru(B, TB)
    if Bpad != B:
        x = jnp.pad(x, ((0, Bpad - B), (0, 0)))
        eps = jnp.pad(eps, ((0, Bpad - B), (0, 0)))
    grid = (Bpad // TB,)

    out_w = _ru(input_dim + 2 * L, _LANE)

    kernel = functools.partial(
        _vae_kernel, input_dim=input_dim, latent_dim=latent_dim, lo=lo)

    flops = 2 * Bpad * (input_dim * 128 + 128 * 64 + 64 * 2 * L
                        + L * 64 + 64 * 128 + 128 * input_dim)
    transcendentals = Bpad * (L + input_dim)                  # exp + tanh
    bytes_accessed = 4 * (x.size + eps.size + wslab.size + bslab.size
                          + Bpad * out_w)

    out = pl.pallas_call(
        kernel,
        out_shape=jax.ShapeDtypeStruct((Bpad, out_w), jnp.float32),
        grid_spec=pltpu.PrefetchScalarGridSpec(
            num_scalar_prefetch=0,
            grid=grid,
            in_specs=[
                pl.BlockSpec((TB, input_dim), lambda i: (i, 0)),     # x tile
                pl.BlockSpec((TB, L), lambda i: (i, 0)),             # eps tile
                pl.BlockSpec((lo["rows"], _LANE), lambda i: (0, 0)), # weights (resident)
                pl.BlockSpec((8, _LANE), lambda i: (0, 0)),          # biases  (resident)
            ],
            out_specs=pl.BlockSpec((TB, out_w), lambda i: (i, 0)),
        ),
        compiler_params=pltpu.CompilerParams(
            dimension_semantics=("parallel",)),
        cost_estimate=pl.CostEstimate(
            flops=flops, transcendentals=transcendentals,
            bytes_accessed=bytes_accessed),
    )(x, eps, wslab, bslab)

    decoded = out[:B, 0:input_dim]
    mu = out[:B, input_dim:input_dim + L]
    log_var = out[:B, input_dim + L:input_dim + 2 * L]
    return decoded, mu, log_var


def _init_linear(key, fan_in, fan_out):
    """PyTorch-style uniform(+-1/sqrt(fan_in)) init; W stored as (in, out)."""
    kw, kb = jax.random.split(key)
    bound = 1.0 / jnp.sqrt(float(fan_in))
    w = jax.random.uniform(kw, (fan_in, fan_out), jnp.float32, -bound, bound)
    b = jax.random.uniform(kb, (fan_out,), jnp.float32, -bound, bound)
    return w, b


def init_vae_params(key, input_dim, latent_dim):
    keys = jax.random.split(key, 7)
    w1, b1 = _init_linear(keys[0], input_dim, 128)
    w2, b2 = _init_linear(keys[1], 128, 64)
    wmu, bmu = _init_linear(keys[2], 64, latent_dim)
    wlv, blv = _init_linear(keys[3], 64, latent_dim)
    w3, b3 = _init_linear(keys[4], latent_dim, 64)
    w4, b4 = _init_linear(keys[5], 64, 128)
    w5, b5 = _init_linear(keys[6], 128, input_dim)
    return dict(w1=w1, b1=b1, w2=w2, b2=b2, wmu=wmu, bmu=bmu,
                wlv=wlv, blv=blv, w3=w3, b3=b3, w4=w4, b4=b4, w5=w5, b5=b5)


def vae_forward_ref(x, eps, p):
    """Pure-JAX reference for correctness checking."""
    h = jnp.maximum(x @ p["w1"] + p["b1"], 0.0)
    h = jnp.maximum(h @ p["w2"] + p["b2"], 0.0)
    mu = h @ p["wmu"] + p["bmu"]
    lv = h @ p["wlv"] + p["blv"]
    z = mu + eps * jnp.exp(0.5 * lv)
    d = jnp.maximum(z @ p["w3"] + p["b3"], 0.0)
    d = jnp.maximum(d @ p["w4"] + p["b4"], 0.0)
    d = jnp.tanh(d @ p["w5"] + p["b5"])
    return d, mu, lv


if __name__ == "__main__":
    B = 8           # batch
    INPUT_DIM = 32  # MFCC feature dimension
    LATENT_DIM = 2  # module default

    key = jax.random.PRNGKey(0)
    k_params, k_x, k_eps = jax.random.split(key, 3)

    params = init_vae_params(k_params, INPUT_DIM, LATENT_DIM)
    x = jax.random.normal(k_x, (B, INPUT_DIM), jnp.float32)
    # eps ~ N(0,1): the stochastic part of reparameterize, sampled outside
    # the kernel for determinism (matches torch.randn_like semantics).
    eps = jax.random.normal(k_eps, (B, LATENT_DIM), jnp.float32)

    decoded, mu, log_var = vae_forward(x, eps, params)
    jax.block_until_ready((decoded, mu, log_var))

    d_ref, mu_ref, lv_ref = vae_forward_ref(x, eps, params)
    assert decoded.shape == (B, INPUT_DIM)
    assert mu.shape == (B, LATENT_DIM) and log_var.shape == (B, LATENT_DIM)
    assert jnp.allclose(decoded, d_ref, atol=1e-4, rtol=1e-4)
    assert jnp.allclose(mu, mu_ref, atol=1e-4, rtol=1e-4)
    assert jnp.allclose(log_var, lv_ref, atol=1e-4, rtol=1e-4)

    print("KERNEL_OK")
</pallas_src>

<mosaic_0001>
module attributes {stable_mosaic.version = 11 : i64} {
  func.func @_vae_kernel(%arg0: i32, %arg1: memref<8x32xf32, #tpu.memory_space<vmem>>, %arg2: memref<8x2xf32, #tpu.memory_space<vmem>>, %arg3: memref<424x128xf32, #tpu.memory_space<vmem>>, %arg4: memref<8x128xf32, #tpu.memory_space<vmem>>, %arg5: memref<8x128xf32, #tpu.memory_space<vmem>>) attributes {dimension_semantics = [#tpu.dimension_semantics<parallel>], iteration_bounds = array<i64: 1>, scalar_prefetch = 0 : i64, scratch_operands = 0 : i64, tpu.core_type = #tpu.core_type<tc>, window_params = [{transform_indices = @transform_0, window_bounds = array<i64: 8, 32>}, {transform_indices = @transform_1, window_bounds = array<i64: 8, 2>}, {pipeline_mode = #tpu.pipeline_mode<synchronous>, transform_indices = @transform_2, window_bounds = array<i64: 424, 128>}, {pipeline_mode = #tpu.pipeline_mode<synchronous>, transform_indices = @transform_3, window_bounds = array<i64: 8, 128>}, {transform_indices = @transform_4, window_bounds = array<i64: 8, 128>}]} {
    %c0 = arith.constant 0 : index
    %c0_0 = arith.constant 0 : index
    %0 = vector.load %arg1[%c0, %c0_0] : memref<8x32xf32, #tpu.memory_space<vmem>>, vector<8x32xf32>
    %c0_1 = arith.constant 0 : index
    %c0_2 = arith.constant 0 : index
    %1 = vector.load %arg2[%c0_1, %c0_2] : memref<8x2xf32, #tpu.memory_space<vmem>>, vector<8x2xf32>
    %c0_3 = arith.constant 0 : index
    %c0_4 = arith.constant 0 : index
    %2 = vector.load %arg3[%c0_3, %c0_4] : memref<424x128xf32, #tpu.memory_space<vmem>>, vector<32x128xf32>
    %cst = arith.constant dense<0.000000e+00> : vector<8x128xf32>
    %3 = tpu.matmul %0, %2, %cst {dimension_numbers = #tpu.dot_dimension_numbers<[1], [0], [0], [1], [0, 0, 1, 1], [], []>} : vector<8x32xf32>, vector<32x128xf32>, vector<8x128xf32> -> vector<8x128xf32>
    %c0_5 = arith.constant 0 : index
    %c0_6 = arith.constant 0 : index
    %4 = vector.load %arg4[%c0_5, %c0_6] : memref<8x128xf32, #tpu.memory_space<vmem>>, vector<1x128xf32>
    %5 = vector.broadcast %4 : vector<1x128xf32> to vector<8x128xf32>
    %6 = arith.addf %3, %5 : vector<8x128xf32>
    %cst_7 = arith.constant 0.000000e+00 : f32
    %7 = vector.broadcast %cst_7 : f32 to vector<8x128xf32>
    %8 = arith.maximumf %6, %7 : vector<8x128xf32>
    %c32 = arith.constant 32 : index
    %c0_8 = arith.constant 0 : index
    %9 = vector.load %arg3[%c32, %c0_8] : memref<424x128xf32, #tpu.memory_space<vmem>>, vector<128x64xf32>
    %cst_9 = arith.constant dense<0.000000e+00> : vector<8x64xf32>
    %10 = tpu.matmul %8, %9, %cst_9 {dimension_numbers = #tpu.dot_dimension_numbers<[1], [0], [0], [1], [0, 0, 1, 1], [], []>} : vector<8x128xf32>, vector<128x64xf32>, vector<8x64xf32> -> vector<8x64xf32>
    %c1 = arith.constant 1 : index
    %c0_10 = arith.constant 0 : index
    %11 = vector.load %arg4[%c1, %c0_10] : memref<8x128xf32, #tpu.memory_space<vmem>>, vector<1x64xf32>
    %12 = vector.broadcast %11 : vector<1x64xf32> to vector<8x64xf32>
    %13 = arith.addf %10, %12 : vector<8x64xf32>
    %cst_11 = arith.constant 0.000000e+00 : f32
    %14 = vector.broadcast %cst_11 : f32 to vector<8x64xf32>
    %15 = arith.maximumf %13, %14 : vector<8x64xf32>
    %c160 = arith.constant 160 : index
    %c0_12 = arith.constant 0 : index
    %16 = vector.load %arg3[%c160, %c0_12] : memref<424x128xf32, #tpu.memory_space<vmem>>, vector<64x4xf32>
    %cst_13 = arith.constant dense<0.000000e+00> : vector<8x4xf32>
    %17 = tpu.matmul %15, %16, %cst_13 {dimension_numbers = #tpu.dot_dimension_numbers<[1], [0], [0], [1], [0, 0, 1, 1], [], []>} : vector<8x64xf32>, vector<64x4xf32>, vector<8x4xf32> -> vector<8x4xf32>
    %c2 = arith.constant 2 : index
    %c0_14 = arith.constant 0 : index
    %18 = vector.load %arg4[%c2, %c0_14] : memref<8x128xf32, #tpu.memory_space<vmem>>, vector<1x4xf32>
    %19 = vector.broadcast %18 : vector<1x4xf32> to vector<8x4xf32>
    %20 = arith.addf %17, %19 : vector<8x4xf32>
    %21 = vector.extract_strided_slice %20 {offsets = [0, 0], sizes = [8, 2], strides = [1, 1]} : vector<8x4xf32> to vector<8x2xf32>
    %22 = vector.extract_strided_slice %20 {offsets = [0, 2], sizes = [8, 2], strides = [1, 1]} : vector<8x4xf32> to vector<8x2xf32>
    %cst_15 = arith.constant 5.000000e-01 : f32
    %23 = vector.broadcast %cst_15 : f32 to vector<8x2xf32>
    %24 = arith.mulf %23, %22 : vector<8x2xf32>
    %25 = math.exp %24 : vector<8x2xf32>
    %26 = arith.mulf %1, %25 : vector<8x2xf32>
    %27 = arith.addf %21, %26 : vector<8x2xf32>
    %c3 = arith.constant 3 : index
    %c0_16 = arith.constant 0 : index
    %28 = vector.load %arg4[%c3, %c0_16] : memref<8x128xf32, #tpu.memory_space<vmem>>, vector<1x64xf32>
    %29 = vector.shape_cast %28 : vector<1x64xf32> to vector<1x64xf32>
    %30 = vector.broadcast %29 : vector<1x64xf32> to vector<8x64xf32>
    %c224 = arith.constant 224 : index
    %c0_17 = arith.constant 0 : index
    %31 = vector.load %arg3[%c224, %c0_17] : memref<424x128xf32, #tpu.memory_space<vmem>>, vector<1x64xf32>
    %32 = vector.extract_strided_slice %27 {offsets = [0, 0], sizes = [8, 1], strides = [1, 1]} : vector<8x2xf32> to vector<8x1xf32>
    %33 = vector.broadcast %32 : vector<8x1xf32> to vector<8x64xf32>
    %34 = vector.broadcast %31 : vector<1x64xf32> to vector<8x64xf32>
    %35 = arith.mulf %33, %34 : vector<8x64xf32>
    %36 = arith.addf %30, %35 : vector<8x64xf32>
    %c225 = arith.constant 225 : index
    %c0_18 = arith.constant 0 : index
    %37 = vector.load %arg3[%c225, %c0_18] : memref<424x128xf32, #tpu.memory_space<vmem>>, vector<1x64xf32>
    %38 = vector.extract_strided_slice %27 {offsets = [0, 1], sizes = [8, 1], strides = [1, 1]} : vector<8x2xf32> to vector<8x1xf32>
    %39 = vector.broadcast %38 : vector<8x1xf32> to vector<8x64xf32>
    %40 = vector.broadcast %37 : vector<1x64xf32> to vector<8x64xf32>
    %41 = arith.mulf %39, %40 : vector<8x64xf32>
    %42 = arith.addf %36, %41 : vector<8x64xf32>
    %cst_19 = arith.constant 0.000000e+00 : f32
    %43 = vector.broadcast %cst_19 : f32 to vector<8x64xf32>
    %44 = arith.maximumf %42, %43 : vector<8x64xf32>
    %c232 = arith.constant 232 : index
    %c0_20 = arith.constant 0 : index
    %45 = vector.load %arg3[%c232, %c0_20] : memref<424x128xf32, #tpu.memory_space<vmem>>, vector<64x128xf32>
    %cst_21 = arith.constant dense<0.000000e+00> : vector<8x128xf32>
    %46 = tpu.matmul %44, %45, %cst_21 {dimension_numbers = #tpu.dot_dimension_numbers<[1], [0], [0], [1], [0, 0, 1, 1], [], []>} : vector<8x64xf32>, vector<64x128xf32>, vector<8x128xf32> -> vector<8x128xf32>
    %c4 = arith.constant 4 : index
    %c0_22 = arith.constant 0 : index
    %47 = vector.load %arg4[%c4, %c0_22] : memref<8x128xf32, #tpu.memory_space<vmem>>, vector<1x128xf32>
    %48 = vector.broadcast %47 : vector<1x128xf32> to vector<8x128xf32>
    %49 = arith.addf %46, %48 : vector<8x128xf32>
    %cst_23 = arith.constant 0.000000e+00 : f32
    %50 = vector.broadcast %cst_23 : f32 to vector<8x128xf32>
    %51 = arith.maximumf %49, %50 : vector<8x128xf32>
    %c296 = arith.constant 296 : index
    %c0_24 = arith.constant 0 : index
    %52 = vector.load %arg3[%c296, %c0_24] : memref<424x128xf32, #tpu.memory_space<vmem>>, vector<128x32xf32>
    %cst_25 = arith.constant dense<0.000000e+00> : vector<8x32xf32>
    %53 = tpu.matmul %51, %52, %cst_25 {dimension_numbers = #tpu.dot_dimension_numbers<[1], [0], [0], [1], [0, 0, 1, 1], [], []>} : vector<8x128xf32>, vector<128x32xf32>, vector<8x32xf32> -> vector<8x32xf32>
    %c5 = arith.constant 5 : index
    %c0_26 = arith.constant 0 : index
    %54 = vector.load %arg4[%c5, %c0_26] : memref<8x128xf32, #tpu.memory_space<vmem>>, vector<1x32xf32>
    %55 = vector.broadcast %54 : vector<1x32xf32> to vector<8x32xf32>
    %56 = arith.addf %53, %55 : vector<8x32xf32>
    %57 = math.tanh %56 : vector<8x32xf32>
    %cst_27 = arith.constant 0.000000e+00 : f32
    %58 = vector.broadcast %cst_27 : f32 to vector<8x92xf32>
    %59 = tpu.concatenate %57, %21, %22, %58 in 1 : vector<8x32xf32>, vector<8x2xf32>, vector<8x2xf32>, vector<8x92xf32> -> vector<8x128xf32>
    %c0_28 = arith.constant 0 : index
    %c0_29 = arith.constant 0 : index
    %60 = vector.load %arg5[%c0_28, %c0_29] : memref<8x128xf32, #tpu.memory_space<vmem>>, vector<8x128xf32>
    tpu.vector_store %arg5[%c0_28, %c0_29], %59 {strides = array<i32>} : memref<8x128xf32, #tpu.memory_space<vmem>>, vector<8x128xf32>,
    return
  }
  func.func @transform_0(%arg0: i32) -> (i32, i32) {
    %c0_i32 = arith.constant 0 : i32
    %c0_i32_0 = arith.constant 0 : i32
    return %arg0, %c0_i32 : i32, i32
  }
  func.func @transform_1(%arg0: i32) -> (i32, i32) {
    %c0_i32 = arith.constant 0 : i32
    %c0_i32_0 = arith.constant 0 : i32
    return %arg0, %c0_i32 : i32, i32
  }
  func.func @transform_2(%arg0: i32) -> (i32, i32) {
    %c0_i32 = arith.constant 0 : i32
    %c0_i32_0 = arith.constant 0 : i32
    %c0_i32_1 = arith.constant 0 : i32
    return %c0_i32, %c0_i32_0 : i32, i32
  }
  func.func @transform_3(%arg0: i32) -> (i32, i32) {
    %c0_i32 = arith.constant 0 : i32
    %c0_i32_0 = arith.constant 0 : i32
    %c0_i32_1 = arith.constant 0 : i32
    return %c0_i32, %c0_i32_0 : i32, i32
  }
  func.func @transform_4(%arg0: i32) -> (i32, i32) {
    %c0_i32 = arith.constant 0 : i32
    %c0_i32_0 = arith.constant 0 : i32
    return %arg0, %c0_i32 : i32, i32
  }
}

</mosaic_0001>

<bundles_post_ra>
// kernel: vae_forward.1
= control target key start
LH: loop header
LB: loop body
LE: loop exit
PB: predicated region body
PF: predicated region fallthrough
CT: control target
= control target key end

     0   :  { %v792_v0 = vmov 0.0|0.0   ;;  %vm793_vm0 = vmmov 0   ;;  %v794_v4 = vmov 0.0   ;;  %vm28_vm1 = vcmask 261120   ;;  %s797_s7 = smov 126   ;;  %s798_s16 = smov 32   ;;  %s1053_s2 = inlined_call_operand.vmem [shape: f32[424,128], index: 2, kind: input, shape index: {}]   ;;  %s1054_s0 = inlined_call_operand.vmem [shape: f32[8,32], index: 0, kind: input, shape index: {}]   ;;  %s1055_s3 = inlined_call_operand.vmem [shape: f32[8,128], index: 3, kind: input, shape index: {}]   ;;  %s1056_s1 = inlined_call_operand.vmem [shape: f32[8,2], index: 1, kind: input, shape index: {}]   ;;  %s1057_s4 = inlined_call_operand.vmem [shape: f32[8,128], index: 4, kind: output, shape index: {}]  }
   0x1   :  { %700 = vmatprep.subr.bf16.mxu0 %v792_v0  ;;  %v19_v1 = vld [vmem:[%s1053_s2] sm:$0xff]  ;;  %v20_v2 = vld [vmem:[%s1053_s2 + $0x8] sm:$0xff]  ;;  %v21_v3 = vld [vmem:[%s1053_s2 + $0x10] sm:$0xff]  ;;  %589 = vmatprep.mubr.msk.f32.mxu0 %vm793_vm0, %v794_v4  ;;  %vm208_vm2 = vcmask 523264   ;;  %v795_v61 = vmov 1   ;;  %v796_v62 = vmov 0  }
   0x2   :  { %v701_v5 = vpack.c.bf16 %v20_v2, %v19_v1  ;;  %v22_v6 = vld [vmem:[%s1053_s2 + $0x18] sm:$0xff]  ;;  %706 = vmatprep.subr.bf16.mxu1 %v792_v0  ;;  %v103_v7 = vld [vmem:[%s1053_s2 + $0x20] sm:$0xff]  ;;  %624 = vmatprep.mubr.msk.f32.mxu1 %vm793_vm0, %v794_v4  ;;  %v104_v8 = vld [vmem:[%s1053_s2 + $0x28] sm:$0xff]  ;;  %vm504_vm3 = vcmask 277504   ;;  %vm506_vm4 = vcmask 293888  }
   0x3   :  { %v105_v9 = vld [vmem:[%s1053_s2 + $0x30] sm:$0xff]  ;;  %v106_v10 = vld [vmem:[%s1053_s2 + $0x38] sm:$0xff]  ;;  %v704_v11 = vpack.c.bf16 %v22_v6, %v21_v3  ;;  %v707_v12 = vpack.c.bf16 %v104_v8, %v103_v7  ;;  %v107_v14 = vld [vmem:[%s1053_s2 + $0x40] sm:$0xff]  ;;  %786 = vset.pattern.permute.xlu1 %v795_v61  ;;  %785 = vset.pattern.permute.xlu0 %v796_v62 }
   0x4   :  { %702 = vmatpush3.bf16.msra.mxu0 %v701_v5  ;;  %v710_v13 = vpack.c.bf16 %v106_v10, %v105_v9  ;;  %v108_v15 = vld [vmem:[%s1053_s2 + $0x48] sm:$0xff]  ;;  %v17_v16 = vld [vmem:[%s1054_s0] sm:$0xff]  ;;  %v109_v18 = vld [vmem:[%s1053_s2 + $0x50] sm:$0xff] }
   0x5   :  { %703 = vmatprep.subr.bf16.mxu0 %v792_v0  ;;  %708 = vmatpush3.bf16.msra.mxu1 %v707_v12  ;;  %v713_v17 = vpack.c.bf16 %v108_v15, %v107_v14  ;;  %v110_v19 = vld [vmem:[%s1053_s2 + $0x58] sm:$0xff]  ;;  %v111_v21 = vld [vmem:[%s1053_s2 + $0x60] sm:$0xff]  ;;  %v112_v22 = vld [vmem:[%s1053_s2 + $0x68] sm:$0xff] }
   0x6   :  { %709 = vmatprep.subr.bf16.mxu1 %v792_v0  ;;  %v716_v20 = vpack.c.bf16 %v110_v19, %v109_v18  ;;  %v719_v23 = vpack.c.bf16 %v112_v22, %v111_v21  ;;  %v113_v24 = vld [vmem:[%s1053_s2 + $0x70] sm:$0xff]  ;;  %v114_v25 = vld [vmem:[%s1053_s2 + $0x78] sm:$0xff]  ;;  %v115_v27 = vld [vmem:[%s1053_s2 + $0x80] sm:$0xff] }
   0x7   :  { %v722_v26 = vpack.c.bf16 %v114_v25, %v113_v24  ;;  %v116_v28 = vld [vmem:[%s1053_s2 + $0x88] sm:$0xff]  ;;  %v117_v30 = vld [vmem:[%s1053_s2 + $0x90] sm:$0xff]  ;;  %v118_v31 = vld [vmem:[%s1053_s2 + $0x98] sm:$0xff] }
   0x8   :  { %705 = vmatpush3.bf16.msra.mxu0 %v704_v11  ;;  %v725_v29 = vpack.c.bf16 %v116_v28, %v115_v27  ;;  %v728_v32 = vpack.c.bf16 %v118_v31, %v117_v30  ;;  %v195_v33 = vld [vmem:[%s1053_s2 + $0xa0] sm:$0xff]  ;;  %v196_v34 = vld [vmem:[%s1053_s2 + $0xa8] sm:$0xff]  ;;  %v197_v35 = vld [vmem:[%s1053_s2 + $0xb0] sm:$0xff] }
   0x9   :  { %730 = vmatprep.subr.bf16.mxu0 %v792_v0  ;;  %711 = vmatpush3.bf16.msra.mxu1 %v710_v13  ;;  %v731_v36 = vpack.c.bf16 %v196_v34, %v195_v33  ;;  %v198_v37 = vld [vmem:[%s1053_s2 + $0xb8] sm:$0xff]  ;;  %v199_v39 = vld [vmem:[%s1053_s2 + $0xc0] sm:$0xff]  ;;  %v200_v40 = vld [vmem:[%s1053_s2 + $0xc8] sm:$0xff] }
   0xa   :  { %712 = vmatprep.subr.bf16.mxu1 %v792_v0  ;;  %v734_v38 = vpack.c.bf16 %v198_v37, %v197_v35  ;;  %v737_v41 = vpack.c.bf16 %v200_v40, %v199_v39  ;;  %v513_v42 = vld [vmem:[%s1055_s3] ss:$0 sm:$0xff]  ;;  %v201_v47 = vld [vmem:[%s1053_s2 + $0xd0] sm:$0xff]  ;;  %v202_v48 = vld [vmem:[%s1053_s2 + $0xd8] sm:$0xff] }
   0xb   :  { %590 = vmatmul.mubr.msk.f32.vlgmr.msra.gmra.mrb[0].mxu0 %vm28_vm1, %v17_v16  ;;  %v740_v49 = vpack.c.bf16 %v202_v48, %v201_v47  ;;  %v515_v50 = vld [vmem:[%s1055_s3 + $0x1] ss:$0 sm:$0xff]  ;;  %v516_v55 = vld [vmem:[%s1055_s3 + $0x2] ss:$0 sm:$0xff]  ;;  %v320_v63 = vld [vmem:[%s1053_s2 + $0xe8] sm:$0xff] }
   0xc   :  { %643 = vmatprep.mubr.msk.f32.mxu0 %vm793_vm0, %v794_v4  ;;  %732 = vmatpush3.bf16.msra.mxu0 %v731_v36  ;;  %v321_v1 = vld [vmem:[%s1053_s2 + $0xf0] sm:$0xff]  ;;  %v322_v2 = vld [vmem:[%s1053_s2 + $0xf8] sm:$0xff]  ;;  %v18_v7 = vld [vmem:[%s1056_s1] sm:$0xff] }
   0xd   :  { %714 = vmatpush3.bf16.msra.mxu1 %v713_v17  ;;  %733 = vmatprep.subr.bf16.mxu0 %v792_v0  ;;  %v743_v3 = vpack.c.bf16 %v321_v1, %v320_v63  ;;  %v324_v11 = vld [vmem:[%s1053_s2 + $0x108] sm:$0xff]  ;;  %v325_v12 = vld [vmem:[%s1053_s2 + $0x110] sm:$0xff]  ;;  %v326_v14 = vld [vmem:[%s1053_s2 + $0x118] sm:$0xff] }
   0xe   :  { %715 = vmatprep.subr.bf16.mxu1 %v792_v0  ;;  %v749_v13 = vpack.c.bf16 %v325_v12, %v324_v11  ;;  %v327_v15 = vld [vmem:[%s1053_s2 + $0x120] sm:$0xff]  ;;  %v407_v17 = vld [vmem:[%s1053_s2 + $0x128] sm:$0xff]  ;;  %v408_v18 = vld [vmem:[%s1053_s2 + $0x130] sm:$0xff] }
   0xf   :  { %v752_v16 = vpack.c.bf16 %v327_v15, %v326_v14  ;;  %v409_v19 = vld [vmem:[%s1053_s2 + $0x138] sm:$0xff]  ;;  %v410_v21 = vld [vmem:[%s1053_s2 + $0x140] sm:$0xff]  ;;  %v412_v24 = vld [vmem:[%s1053_s2 + $0x150] sm:$0xff] }
  0x10   :  { %735 = vmatpush3.bf16.msra.mxu0 %v734_v38  ;;  %v758_v22 = vpack.c.bf16 %v410_v21, %v409_v19  ;;  %v414_v27 = vld [vmem:[%s1053_s2 + $0x160] sm:$0xff]  ;;  %v416_v30 = vld [vmem:[%s1053_s2 + $0x170] sm:$0xff]  ;;  %v419_v35 = vld [vmem:[%s1053_s2 + $0x188] sm:$0xff] }
  0x11   :  { %717 = vmatpush3.bf16.msra.mxu1 %v716_v20  ;;  %736 = vmatprep.subr.bf16.mxu0 %v792_v0  ;;  %v755_v20 = vpack.c.bf16 %v408_v18, %v407_v17  ;;  %v418_v33 = vld [vmem:[%s1053_s2 + $0x180] sm:$0xff]  ;;  %v420_v36 = vld [vmem:[%s1053_s2 + $0x190] sm:$0xff] }
  0x12   :  { %718 = vmatprep.subr.bf16.mxu1 %v792_v0  ;;  %v773_v37 = vpack.c.bf16 %v420_v36, %v419_v35  ;;  %v519_v38 = vld [vmem:[%s1053_s2 + $0xe0] ss:$0 sm:$0xff]  ;;  %v520_v39 = vld [vmem:[%s1053_s2 + $0xe1] ss:$0 sm:$0xff] }
  0x13   :  { %v422_v48 = vld [vmem:[%s1053_s2 + $0x1a0] sm:$0xff] }
  0x14   :  { %738 = vmatpush3.bf16.msra.mxu0 %v737_v41  ;;  %v518_v41 = vld [vmem:[%s1055_s3 + $0x3] ss:$0 sm:$0xff] }
  0x15   :  { %720 = vmatpush3.bf16.msra.mxu1 %v719_v23  ;;  %739 = vmatprep.subr.bf16.mxu0 %v792_v0  ;;  %v411_v23 = vld [vmem:[%s1053_s2 + $0x148] sm:$0xff] }
  0x16   :  { %721 = vmatprep.subr.bf16.mxu1 %v792_v0  ;;  %v761_v25 = vpack.c.bf16 %v412_v24, %v411_v23 }
  0x18   :  { %741 = vmatpush3.bf16.msra.mxu0 %v740_v49 }
  0x19   :  { %723 = vmatpush3.bf16.msra.mxu1 %v722_v26  ;;  %742 = vmatprep.subr.bf16.mxu0 %v792_v0  ;;  %v413_v26 = vld [vmem:[%s1053_s2 + $0x158] sm:$0xff] }
  0x1a   :  { %724 = vmatprep.subr.bf16.mxu1 %v792_v0  ;;  %v764_v28 = vpack.c.bf16 %v414_v27, %v413_v26 }
  0x1d   :  { %726 = vmatpush3.bf16.msra.mxu1 %v725_v29  ;;  %v415_v29 = vld [vmem:[%s1053_s2 + $0x168] sm:$0xff] }
  0x1e   :  { %727 = vmatprep.subr.bf16.mxu1 %v792_v0  ;;  %v767_v31 = vpack.c.bf16 %v416_v30, %v415_v29 }
  0x21   :  { %729 = vmatpush3.bf16.msra.mxu1 %v728_v32  ;;  %v417_v32 = vld [vmem:[%s1053_s2 + $0x178] sm:$0xff] }
  0x22   :  { %754 = vmatprep.subr.bf16.mxu1 %v792_v0  ;;  %v770_v34 = vpack.c.bf16 %v418_v33, %v417_v32 }
  0xde   :  { %v98_v43 = vpop.f32.mrb[0].mxu0 }
  0xdf   :  { %v99_v44 = vadd.f32 %v513_v42, %v98_v43  ;;  %v591_v45 = vpop.f32.mrb[1].mxu0 }
  0xe1   :  { %v102_v46 = vmax.f32 %v99_v44, 0.0 }
  0xe3   :  { %625 = vmatmul.mubr.f32.vlgmr.msra.gmra.mrb[0].mxu1 %v102_v46 }
  0xe4   :  { %697 = vmatprep.mubr.msk.f32.mxu1 %vm793_vm0, %v794_v4  ;;  %756 = vmatpush3.bf16.msra.mxu1 %v755_v20 }
  0xe5   :  { %757 = vmatprep.subr.bf16.mxu1 %v792_v0 }
  0xe8   :  { %759 = vmatpush3.bf16.msra.mxu1 %v758_v22 }
  0xe9   :  { %760 = vmatprep.subr.bf16.mxu1 %v792_v0 }
  0xec   :  { %762 = vmatpush3.bf16.msra.mxu1 %v761_v25 }
  0xed   :  { %763 = vmatprep.subr.bf16.mxu1 %v792_v0 }
  0xf0   :  { %765 = vmatpush3.bf16.msra.mxu1 %v764_v28 }
  0xf1   :  { %766 = vmatprep.subr.bf16.mxu1 %v792_v0 }
  0xf4   :  { %768 = vmatpush3.bf16.msra.mxu1 %v767_v31 }
  0xf5   :  { %769 = vmatprep.subr.bf16.mxu1 %v792_v0 }
  0xf8   :  { %771 = vmatpush3.bf16.msra.mxu1 %v770_v34 }
  0xf9   :  { %772 = vmatprep.subr.bf16.mxu1 %v792_v0 }
  0xfc   :  { %774 = vmatpush3.bf16.msra.mxu1 %v773_v37 }
  0xfd   :  { %775 = vmatprep.subr.bf16.mxu1 %v792_v0 }
 0x1b6   :  { %v190_v51 = vpop.f32.mrb[0].mxu1 }
 0x1b7   :  { %v191_v52 = vadd.f32 %v515_v50, %v190_v51  ;;  %v626_v53 = vpop.f32.mrb[1].mxu1  ;;  %v521_v50 = vld [vmem:[%s1055_s3 + $0x4] ss:$0 sm:$0xff] }
 0x1b9   :  { %v194_v54 = vmax.f32 %v191_v52, 0.0 }
 0x1bb   :  { %644 = vmatmul.mubr.msk.f32.vlgmr.msra.gmra.mrb[2].mxu0 %vm208_vm2, %v194_v54 }
 0x1bc   :  { %662 = vmatprep.mubr.msk.f32.mxu0 %vm793_vm0, %v794_v4  ;;  %v323_v4 = vld [vmem:[%s1053_s2 + $0x100] sm:$0xff]  ;;  %744 = vmatpush3.bf16.msra.mxu0 %v743_v3 }
 0x1bd   :  { %v746_v5 = vpack.c.bf16 %v323_v4, %v322_v2  ;;  %745 = vmatprep.subr.bf16.mxu0 %v792_v0 }
 0x1c0   :  { %747 = vmatpush3.bf16.msra.mxu0 %v746_v5 }
 0x1c1   :  { %748 = vmatprep.subr.bf16.mxu0 %v792_v0 }
 0x1c4   :  { %750 = vmatpush3.bf16.msra.mxu0 %v749_v13 }
 0x1c5   :  { %751 = vmatprep.subr.bf16.mxu0 %v792_v0  ;;  %v421_v0 = vld [vmem:[%s1053_s2 + $0x198] sm:$0xff] }
 0x1c6   :  { %v776_v49 = vpack.c.bf16 %v422_v48, %v421_v0 }
 0x1c8   :  { %753 = vmatpush3.bf16.msra.mxu0 %v752_v16  ;;  %777 = vmatpush3.bf16.msra.mxu1 %v776_v49 }
 0x28e   :  { %v278_v56 = vpop.f32.mrb[2].mxu0 }
 0x28f   :  { %v279_v57 = vadd.f32 %v516_v55, %v278_v56  ;;  %v645_v58 = vpop.f32.mrb[3].mxu0  ;;  %v523_v55 = vld [vmem:[%s1055_s3 + $0x5] ss:$0 sm:$0xff] }
 0x291   :  { %v282_v59 = vmul.f32 0.5, %v279_v57 }
 0x293   :  { %v283_v60 = vmul.f32 1.442695, %v282_v59 }
 0x295   :  { %788 = vpow2.f32 %v283_v60 }
 0x29f   :  { %v789_v6 = vpop.eup %788 }
 0x2a0   :  { %286 = vrot.lane.b32.xlu0 %v789_v6, %s797_s7 }
 0x312   :  { %v287_v8 = vpop.permute.xlu0 %286 }
 0x313   :  { %v289_v9 = vmul.f32 %v287_v8, %v18_v7 }
 0x315   :  { %v290_v10 = vadd.f32 %v289_v9, %v279_v57 }
 0x317   :  { %310 = vperm.xlu1 %786, %v290_v10   ;;  %299 = vperm.xlu0 %785, %v290_v10  }
 0x31b   :  { %500 = vrot.lane.b32.xlu1 %v279_v57, %s798_s16  ;;  %787 = vset.pattern.permute.xlu0 %v795_v61 }
 0x396   :  { %v311_v40 = vpop.permute.xlu1 %310  ;;  %v300_v42 = vpop.permute.xlu0 %299 }
 0x397   :  { %v306_v43 = vmul.f32 %v519_v38, %v300_v42  ;;  %v317_v44 = vmul.f32 %v520_v39, %v311_v40 }
 0x399   :  { %v307_v45 = vadd.f32 %v518_v41, %v306_v43 }
 0x39a   :  { %v501_v60 = vpop.permute.xlu1 %500 }
 0x39b   :  { %v318_v46 = vadd.f32 %v317_v44, %v307_v45 }
 0x39d   :  { %v319_v47 = vmax.f32 %v318_v46, 0.0 }
 0x39f   :  { %663 = vmatmul.mubr.msk.f32.vlgmr.msra.gmra.mrb[4].mxu0 %vm208_vm2, %v319_v47 }
 0x472   :  { %v402_v51 = vpop.f32.mrb[4].mxu0 }
 0x473   :  { %v403_v52 = vadd.f32 %v521_v50, %v402_v51  ;;  %v664_v53 = vpop.f32.mrb[5].mxu0 }
 0x475   :  { %v406_v54 = vmax.f32 %v403_v52, 0.0 }
 0x477   :  { %698 = vmatmul.mubr.f32.vlgmr.msra.gmra.mrb[2].mxu1 %v406_v54 }
 0x54a   :  { %v494_v56 = vpop.f32.mrb[2].mxu1 }
 0x54b   :  { %v495_v57 = vadd.f32 %v523_v55, %v494_v56  ;;  %v699_v58 = vpop.f32.mrb[3].mxu1 }
 0x54d   :  { %790 = vtanh.f32 %v495_v57 }
 0x557   :  { %v791_v59 = vpop.eup %790 }
 0x558   :  { %v503_v61 = vsel %vm28_vm1, %v791_v59, %v501_v60 }
 0x559   :  { %v505_v62 = vsel %vm504_vm3, %v503_v61, %v501_v60 }
 0x55a   :  { %v507_v63 = vsel %vm506_vm4, %v505_v62, 0.0 }
 0x55b   :  { %508 = vst [vmem:[%s1057_s4] sm:$0xff] %v507_v63 }

</bundles_post_ra>
